<compile_context>
chip_gen: v5e
topology: v5e:2x2
jax: 0.10.0
libtpu: 0.0.40
codegen_flags: <defaults>
</compile_context>

<pallas_src>
import functools

import jax
import jax.numpy as jnp
from jax.experimental import pallas as pl
from jax.experimental.pallas import tpu as pltpu

_LANE = 128


def _round_up(n, m):
    return ((n + m - 1) // m) * m


def _node_tiles(n):
    """Pick (tm, tk, n_padded) for the node dimension.

    tk always divides n_padded and tm divides tk's padding unit, so both grid
    extents are exact. Small graphs use a single 128 tile; large graphs use
    256 row-tiles x 512 reduction-tiles (well under VMEM on all generations).
    """
    if n <= 256:
        t = _LANE
        return t, t, _round_up(n, t)
    tm, tk = 256, 512
    return tm, tk, _round_up(n, tk)


def _fused_layer1_kernel(adj_ref, xw1_ref, w2_ref, o_ref, acc_ref):
    """acc += adj_tile @ xw1_tile ; last k: out = relu(acc) @ w2."""
    @pl.when(pl.program_id(1) == 0)
    def _init():
        acc_ref[...] = jnp.zeros_like(acc_ref)

    acc_ref[...] += jnp.dot(adj_ref[...], xw1_ref[...],
                            preferred_element_type=jnp.float32)

    @pl.when(pl.program_id(1) == pl.num_programs(1) - 1)
    def _epilogue():
        z1 = jnp.maximum(acc_ref[...], 0.0).astype(w2_ref.dtype)
        o_ref[...] = jnp.dot(z1, w2_ref[...],
                             preferred_element_type=jnp.float32
                             ).astype(o_ref.dtype)


def _adj_matmul_kernel(adj_ref, b_ref, o_ref, acc_ref):
    """acc += adj_tile @ b_tile ; last k: store."""
    @pl.when(pl.program_id(1) == 0)
    def _init():
        acc_ref[...] = jnp.zeros_like(acc_ref)

    acc_ref[...] += jnp.dot(adj_ref[...], b_ref[...],
                            preferred_element_type=jnp.float32)

    @pl.when(pl.program_id(1) == pl.num_programs(1) - 1)
    def _store():
        o_ref[...] = acc_ref[...].astype(o_ref.dtype)


def _fused_layer1(adj, xw1, w2, *, tm, tk):
    """y1 = relu(adj @ xw1) @ w2, tiled (M rows) x (K reduction)."""
    M, K = adj.shape
    Kx, Hp = xw1.shape
    Hw, Op = w2.shape
    assert K == Kx and Hp == Hw and M % tm == 0 and K % tk == 0
    grid = (M // tm, K // tk)
    itemsize = adj.dtype.itemsize
    flops = 2 * M * K * Hp + 2 * M * Hp * Op
    bytes_accessed = (M * K + grid[0] * K * Hp + Hp * Op + M * Op) * itemsize
    return pl.pallas_call(
        _fused_layer1_kernel,
        out_shape=jax.ShapeDtypeStruct((M, Op), jnp.bfloat16),
        grid_spec=pltpu.PrefetchScalarGridSpec(
            num_scalar_prefetch=0,
            grid=grid,
            in_specs=[
                pl.BlockSpec((tm, tk), lambda i, k: (i, k)),
                pl.BlockSpec((tk, Hp), lambda i, k: (k, 0)),
                pl.BlockSpec((Hp, Op), lambda i, k: (0, 0)),
            ],
            out_specs=pl.BlockSpec((tm, Op), lambda i, k: (i, 0)),
            scratch_shapes=[pltpu.VMEM((tm, Hp), jnp.float32)],
        ),
        compiler_params=pltpu.CompilerParams(
            dimension_semantics=("parallel", "arbitrary")),
        cost_estimate=pl.CostEstimate(flops=flops, transcendentals=0,
                                      bytes_accessed=bytes_accessed),
    )(adj, xw1, w2)


def _adj_matmul(adj, b, *, tm, tk):
    """out = adj @ b (f32 output), tiled (M rows) x (K reduction)."""
    M, K = adj.shape
    Kb, Op = b.shape
    assert K == Kb and M % tm == 0 and K % tk == 0
    grid = (M // tm, K // tk)
    itemsize = adj.dtype.itemsize
    flops = 2 * M * K * Op
    bytes_accessed = (M * K + grid[0] * K * Op) * itemsize + M * Op * 4
    return pl.pallas_call(
        _adj_matmul_kernel,
        out_shape=jax.ShapeDtypeStruct((M, Op), jnp.float32),
        grid_spec=pltpu.PrefetchScalarGridSpec(
            num_scalar_prefetch=0,
            grid=grid,
            in_specs=[
                pl.BlockSpec((tm, tk), lambda i, k: (i, k)),
                pl.BlockSpec((tk, Op), lambda i, k: (k, 0)),
            ],
            out_specs=pl.BlockSpec((tm, Op), lambda i, k: (i, 0)),
            scratch_shapes=[pltpu.VMEM((tm, Op), jnp.float32)],
        ),
        compiler_params=pltpu.CompilerParams(
            dimension_semantics=("parallel", "arbitrary")),
        cost_estimate=pl.CostEstimate(flops=flops, transcendentals=0,
                                      bytes_accessed=bytes_accessed),
    )(adj, b)


@functools.partial(jax.jit, static_argnames=("compute_dtype",))
def gcn_forward(adj, x, w1, w2, *, compute_dtype=jnp.bfloat16):
    """z1 = relu(adj @ (x @ w1)); z2 = adj @ (z1 @ w2)  (dense-adj path)."""
    N = adj.shape[0]
    F_in = x.shape[1]
    H = w1.shape[1]
    O = w2.shape[1]

    tm, tk, npad = _node_tiles(N)
    hp = max(_LANE, _round_up(H, _LANE))
    op = max(_LANE, _round_up(O, _LANE))

    # Zero-pad: extra rows/cols contribute nothing and are stripped at the end.
    adj_p = jnp.zeros((npad, npad), compute_dtype).at[:N, :N].set(
        adj.astype(compute_dtype))
    w1_p = jnp.zeros((F_in, hp), compute_dtype).at[:, :H].set(
        w1.astype(compute_dtype))
    w2_p = jnp.zeros((hp, op), compute_dtype).at[:H, :O].set(
        w2.astype(compute_dtype))

    # Tiny feature matmul: leave to plain XLA (bf16 operands, f32 accumulate).
    xw1 = jnp.dot(x.astype(compute_dtype), w1_p,
                  preferred_element_type=jnp.float32).astype(compute_dtype)
    xw1_p = jnp.zeros((npad, hp), compute_dtype).at[:N, :].set(xw1)

    # Layer 1 + fused z1@w2 epilogue:  y1 = relu(adj @ xw1) @ w2   (bf16)
    y1 = _fused_layer1(adj_p, xw1_p, w2_p, tm=tm, tk=tk)
    # Layer 2:  z2 = adj @ y1   (f32 output)
    z2 = _adj_matmul(adj_p, y1, tm=tm, tk=tk)
    return z2[:N, :O]
    # TODO(synk): SparseTensor/spmm branch of azw (COO sparse adjacency) is not
    # implemented; only the dense `adj.matmul(...)` path is reproduced.


if __name__ == "__main__":
    # Small, GCN-consistent shapes: N nodes, F_in input feats, H hidden, O out.
    N, F_IN, H, O = 128, 64, 32, 16
    key = jax.random.PRNGKey(0)
    k_adj, k_x, k_w1, k_w2 = jax.random.split(key, 4)

    # Deterministic dense "normalized adjacency" and inputs/weights.
    a_raw = jax.random.uniform(k_adj, (N, N), dtype=jnp.float32)
    adj = a_raw / jnp.sum(a_raw, axis=-1, keepdims=True)  # row-normalized
    x = jax.random.normal(k_x, (N, F_IN), dtype=jnp.float32)
    w1 = jax.random.normal(k_w1, (F_IN, H), dtype=jnp.float32) * 0.1
    w2 = jax.random.normal(k_w2, (H, O), dtype=jnp.float32) * 0.1

    out = jax.block_until_ready(gcn_forward(adj, x, w1, w2))

    # Pure-JAX f32 reference; loose tolerance since the kernels run in bf16
    # with f32 accumulation (deliberate perf tradeoff).
    z1_ref = jnp.maximum(adj @ (x @ w1), 0.0)
    z2_ref = adj @ (z1_ref @ w2)
    assert out.shape == (N, O)
    assert jnp.allclose(out, z2_ref, atol=1e-2, rtol=5e-2), (
        float(jnp.max(jnp.abs(out - z2_ref))))

    print("KERNEL_OK")
</pallas_src>

<mosaic_0001>
module attributes {stable_mosaic.version = 11 : i64} {
  func.func @_fused_layer1_kernel(%arg0: i32, %arg1: i32, %arg2: memref<128x128xbf16, #tpu.memory_space<vmem>>, %arg3: memref<128x128xbf16, #tpu.memory_space<vmem>>, %arg4: memref<128x128xbf16, #tpu.memory_space<vmem>>, %arg5: memref<128x128xbf16, #tpu.memory_space<vmem>>, %arg6: memref<128x128xf32, #tpu.memory_space<vmem>>) attributes {dimension_semantics = [#tpu.dimension_semantics<parallel>, #tpu.dimension_semantics<arbitrary>], iteration_bounds = array<i64: 1, 1>, scalar_prefetch = 0 : i64, scratch_operands = 1 : i64, tpu.core_type = #tpu.core_type<tc>, window_params = [{transform_indices = @transform_0, window_bounds = array<i64: 128, 128>}, {transform_indices = @transform_1, window_bounds = array<i64: 128, 128>}, {pipeline_mode = #tpu.pipeline_mode<synchronous>, transform_indices = @transform_2, window_bounds = array<i64: 128, 128>}, {transform_indices = @transform_3, window_bounds = array<i64: 128, 128>}]} {
    %c0_i32 = arith.constant 0 : i32
    %0 = arith.cmpi eq, %arg1, %c0_i32 : i32
    %1 = arith.extui %0 : i1 to i32
    %c0_i32_0 = arith.constant 0 : i32
    %2 = arith.cmpi ne, %1, %c0_i32_0 : i32
    scf.if %2 {
      %cst_10 = arith.constant 0.000000e+00 : f32
      %12 = vector.broadcast %cst_10 : f32 to vector<128x128xf32>
      %c0_11 = arith.constant 0 : index
      %c0_12 = arith.constant 0 : index
      %13 = vector.load %arg6[%c0_11, %c0_12] : memref<128x128xf32, #tpu.memory_space<vmem>>, vector<128x128xf32>
      tpu.vector_store %arg6[%c0_11, %c0_12], %12 {strides = array<i32>} : memref<128x128xf32, #tpu.memory_space<vmem>>, vector<128x128xf32>,
    } else {
    }
    %c0 = arith.constant 0 : index
    %c0_1 = arith.constant 0 : index
    %3 = vector.load %arg6[%c0, %c0_1] : memref<128x128xf32, #tpu.memory_space<vmem>>, vector<128x128xf32>
    %c0_2 = arith.constant 0 : index
    %c0_3 = arith.constant 0 : index
    %4 = vector.load %arg2[%c0_2, %c0_3] : memref<128x128xbf16, #tpu.memory_space<vmem>>, vector<128x128xbf16>
    %c0_4 = arith.constant 0 : index
    %c0_5 = arith.constant 0 : index
    %5 = vector.load %arg3[%c0_4, %c0_5] : memref<128x128xbf16, #tpu.memory_space<vmem>>, vector<128x128xbf16>
    %cst = arith.constant dense<0.000000e+00> : vector<128x128xf32>
    %6 = tpu.matmul %4, %5, %cst {dimension_numbers = #tpu.dot_dimension_numbers<[1], [0], [0], [1], [0, 0, 1, 1], [], []>} : vector<128x128xbf16>, vector<128x128xbf16>, vector<128x128xf32> -> vector<128x128xf32>
    %7 = arith.addf %3, %6 : vector<128x128xf32>
    %c0_6 = arith.constant 0 : index
    %c0_7 = arith.constant 0 : index
    %8 = vector.load %arg6[%c0_6, %c0_7] : memref<128x128xf32, #tpu.memory_space<vmem>>, vector<128x128xf32>
    tpu.vector_store %arg6[%c0_6, %c0_7], %7 {strides = array<i32>} : memref<128x128xf32, #tpu.memory_space<vmem>>, vector<128x128xf32>,
    %c0_i32_8 = arith.constant 0 : i32
    %9 = arith.cmpi eq, %arg1, %c0_i32_8 : i32
    %10 = arith.extui %9 : i1 to i32
    %c0_i32_9 = arith.constant 0 : i32
    %11 = arith.cmpi ne, %10, %c0_i32_9 : i32
    scf.if %11 {
      %c0_10 = arith.constant 0 : index
      %c0_11 = arith.constant 0 : index
      %12 = vector.load %arg6[%c0_10, %c0_11] : memref<128x128xf32, #tpu.memory_space<vmem>>, vector<128x128xf32>
      %cst_12 = arith.constant 0.000000e+00 : f32
      %13 = vector.broadcast %cst_12 : f32 to vector<128x128xf32>
      %14 = arith.maximumf %12, %13 : vector<128x128xf32>
      %15 = arith.truncf %14 : vector<128x128xf32> to vector<128x128xbf16>
      %c0_13 = arith.constant 0 : index
      %c0_14 = arith.constant 0 : index
      %16 = vector.load %arg4[%c0_13, %c0_14] : memref<128x128xbf16, #tpu.memory_space<vmem>>, vector<128x128xbf16>
      %cst_15 = arith.constant dense<0.000000e+00> : vector<128x128xf32>
      %17 = tpu.matmul %15, %16, %cst_15 {dimension_numbers = #tpu.dot_dimension_numbers<[1], [0], [0], [1], [0, 0, 1, 1], [], []>} : vector<128x128xbf16>, vector<128x128xbf16>, vector<128x128xf32> -> vector<128x128xf32>
      %18 = arith.truncf %17 : vector<128x128xf32> to vector<128x128xbf16>
      %c0_16 = arith.constant 0 : index
      %c0_17 = arith.constant 0 : index
      %19 = vector.load %arg5[%c0_16, %c0_17] : memref<128x128xbf16, #tpu.memory_space<vmem>>, vector<128x128xbf16>
      tpu.vector_store %arg5[%c0_16, %c0_17], %18 {strides = array<i32>} : memref<128x128xbf16, #tpu.memory_space<vmem>>, vector<128x128xbf16>,
    } else {
    }
    return
  }
  func.func @transform_0(%arg0: i32, %arg1: i32) -> (i32, i32) {
    %c0_i32 = arith.constant 0 : i32
    return %arg0, %arg1 : i32, i32
  }
  func.func @transform_1(%arg0: i32, %arg1: i32) -> (i32, i32) {
    %c0_i32 = arith.constant 0 : i32
    %c0_i32_0 = arith.constant 0 : i32
    return %arg1, %c0_i32 : i32, i32
  }
  func.func @transform_2(%arg0: i32, %arg1: i32) -> (i32, i32) {
    %c0_i32 = arith.constant 0 : i32
    %c0_i32_0 = arith.constant 0 : i32
    %c0_i32_1 = arith.constant 0 : i32
    return %c0_i32, %c0_i32_0 : i32, i32
  }
  func.func @transform_3(%arg0: i32, %arg1: i32) -> (i32, i32) {
    %c0_i32 = arith.constant 0 : i32
    %c0_i32_0 = arith.constant 0 : i32
    return %arg0, %c0_i32 : i32, i32
  }
}

module attributes {stable_mosaic.version = 11 : i64} {
  func.func @_adj_matmul_kernel(%arg0: i32, %arg1: i32, %arg2: memref<128x128xbf16, #tpu.memory_space<vmem>>, %arg3: memref<128x128xbf16, #tpu.memory_space<vmem>>, %arg4: memref<128x128xf32, #tpu.memory_space<vmem>>, %arg5: memref<128x128xf32, #tpu.memory_space<vmem>>) attributes {dimension_semantics = [#tpu.dimension_semantics<parallel>, #tpu.dimension_semantics<arbitrary>], iteration_bounds = array<i64: 1, 1>, scalar_prefetch = 0 : i64, scratch_operands = 1 : i64, tpu.core_type = #tpu.core_type<tc>, window_params = [{transform_indices = @transform_0, window_bounds = array<i64: 128, 128>}, {transform_indices = @transform_1, window_bounds = array<i64: 128, 128>}, {transform_indices = @transform_2, window_bounds = array<i64: 128, 128>}]} {
    %c0_i32 = arith.constant 0 : i32
    %0 = arith.cmpi eq, %arg1, %c0_i32 : i32
    %1 = arith.extui %0 : i1 to i32
    %c0_i32_0 = arith.constant 0 : i32
    %2 = arith.cmpi ne, %1, %c0_i32_0 : i32
    scf.if %2 {
      %cst_10 = arith.constant 0.000000e+00 : f32
      %12 = vector.broadcast %cst_10 : f32 to vector<128x128xf32>
      %c0_11 = arith.constant 0 : index
      %c0_12 = arith.constant 0 : index
      %13 = vector.load %arg5[%c0_11, %c0_12] : memref<128x128xf32, #tpu.memory_space<vmem>>, vector<128x128xf32>
      tpu.vector_store %arg5[%c0_11, %c0_12], %12 {strides = array<i32>} : memref<128x128xf32, #tpu.memory_space<vmem>>, vector<128x128xf32>,
    } else {
    }
    %c0 = arith.constant 0 : index
    %c0_1 = arith.constant 0 : index
    %3 = vector.load %arg5[%c0, %c0_1] : memref<128x128xf32, #tpu.memory_space<vmem>>, vector<128x128xf32>
    %c0_2 = arith.constant 0 : index
    %c0_3 = arith.constant 0 : index
    %4 = vector.load %arg2[%c0_2, %c0_3] : memref<128x128xbf16, #tpu.memory_space<vmem>>, vector<128x128xbf16>
    %c0_4 = arith.constant 0 : index
    %c0_5 = arith.constant 0 : index
    %5 = vector.load %arg3[%c0_4, %c0_5] : memref<128x128xbf16, #tpu.memory_space<vmem>>, vector<128x128xbf16>
    %cst = arith.constant dense<0.000000e+00> : vector<128x128xf32>
    %6 = tpu.matmul %4, %5, %cst {dimension_numbers = #tpu.dot_dimension_numbers<[1], [0], [0], [1], [0, 0, 1, 1], [], []>} : vector<128x128xbf16>, vector<128x128xbf16>, vector<128x128xf32> -> vector<128x128xf32>
    %7 = arith.addf %3, %6 : vector<128x128xf32>
    %c0_6 = arith.constant 0 : index
    %c0_7 = arith.constant 0 : index
    %8 = vector.load %arg5[%c0_6, %c0_7] : memref<128x128xf32, #tpu.memory_space<vmem>>, vector<128x128xf32>
    tpu.vector_store %arg5[%c0_6, %c0_7], %7 {strides = array<i32>} : memref<128x128xf32, #tpu.memory_space<vmem>>, vector<128x128xf32>,
    %c0_i32_8 = arith.constant 0 : i32
    %9 = arith.cmpi eq, %arg1, %c0_i32_8 : i32
    %10 = arith.extui %9 : i1 to i32
    %c0_i32_9 = arith.constant 0 : i32
    %11 = arith.cmpi ne, %10, %c0_i32_9 : i32
    scf.if %11 {
      %c0_10 = arith.constant 0 : index
      %c0_11 = arith.constant 0 : index
      %12 = vector.load %arg5[%c0_10, %c0_11] : memref<128x128xf32, #tpu.memory_space<vmem>>, vector<128x128xf32>
      %c0_12 = arith.constant 0 : index
      %c0_13 = arith.constant 0 : index
      %13 = vector.load %arg4[%c0_12, %c0_13] : memref<128x128xf32, #tpu.memory_space<vmem>>, vector<128x128xf32>
      tpu.vector_store %arg4[%c0_12, %c0_13], %12 {strides = array<i32>} : memref<128x128xf32, #tpu.memory_space<vmem>>, vector<128x128xf32>,
    } else {
    }
    return
  }
  func.func @transform_0(%arg0: i32, %arg1: i32) -> (i32, i32) {
    %c0_i32 = arith.constant 0 : i32
    return %arg0, %arg1 : i32, i32
  }
  func.func @transform_1(%arg0: i32, %arg1: i32) -> (i32, i32) {
    %c0_i32 = arith.constant 0 : i32
    %c0_i32_0 = arith.constant 0 : i32
    return %arg1, %c0_i32 : i32, i32
  }
  func.func @transform_2(%arg0: i32, %arg1: i32) -> (i32, i32) {
    %c0_i32 = arith.constant 0 : i32
    %c0_i32_0 = arith.constant 0 : i32
    return %arg0, %c0_i32 : i32, i32
  }
}

</mosaic_0001>

<bundles_post_ra>
// kernel: gcn_forward.3
= control target key start
LH: loop header
LB: loop body
LE: loop exit
PB: predicated region body
PF: predicated region fallthrough
CT: control target
= control target key end

     0   :  { %s510_s1 = inlined_call_operand.vmem [shape: bf16[128,128], index: 1, kind: input, shape index: {}]   ;;  %s511_s0 = inlined_call_operand.vmem [shape: bf16[128,128], index: 0, kind: input, shape index: {}]   ;;  %s512_s2 = inlined_call_operand.vmem [shape: f32[128,128], index: 2, kind: output, shape index: {}]  }
   0x1   :  { %v374_v0 = vld [vmem:[%s510_s1 + $0x38] sm:$0xff]  ;;  %v373_v1 = vld [vmem:[%s510_s1 + $0x30] sm:$0xff]  ;;  %v372_v2 = vld [vmem:[%s510_s1 + $0x28] sm:$0xff] }
   0x2   :  { %175 = vmatpush.bf16.msra.mxu0 %v374_v0  ;;  %375 = vmatpush.bf16.msra.mxu1 %v374_v0  ;;  %v371_v3 = vld [vmem:[%s510_s1 + $0x20] sm:$0xff]  ;;  %v370_v4 = vld [vmem:[%s510_s1 + $0x18] sm:$0xff]  ;;  %v369_v5 = vld [vmem:[%s510_s1 + $0x10] sm:$0xff] }
   0x3   :  { %376 = vmatpush.bf16.msra.mxu2 %v374_v0  ;;  %377 = vmatpush.bf16.msra.mxu3 %v374_v0  ;;  %v368_v6 = vld [vmem:[%s510_s1 + $0x8] sm:$0xff]  ;;  %v367_v7 = vld [vmem:[%s510_s1] sm:$0xff]  ;;  %v361_v9 = vld [vmem:[%s511_s0 + $0x10] sm:$0xff] }
   0x4   :  { %v359_v8 = vld [vmem:[%s511_s0] sm:$0xff]  ;;  %v365_v11 = vld [vmem:[%s511_s0 + $0x30] sm:$0xff]  ;;  %v360_v12 = vld [vmem:[%s511_s0 + $0x8] sm:$0xff] }
   0x5   :  { %v363_v10 = vld [vmem:[%s511_s0 + $0x20] sm:$0xff]  ;;  %v362_v13 = vld [vmem:[%s511_s0 + $0x18] sm:$0xff]  ;;  %v364_v14 = vld [vmem:[%s511_s0 + $0x28] sm:$0xff] }
   0x6   :  { %176 = vmatpush.bf16.msra.mxu0 %v373_v1  ;;  %378 = vmatpush.bf16.msra.mxu1 %v373_v1  ;;  %v366_v15 = vld [vmem:[%s511_s0 + $0x38] sm:$0xff] }
   0x7   :  { %379 = vmatpush.bf16.msra.mxu2 %v373_v1  ;;  %380 = vmatpush.bf16.msra.mxu3 %v373_v1 }
   0xa   :  { %177 = vmatpush.bf16.msra.mxu0 %v372_v2  ;;  %381 = vmatpush.bf16.msra.mxu1 %v372_v2 }
   0xb   :  { %382 = vmatpush.bf16.msra.mxu2 %v372_v2  ;;  %383 = vmatpush.bf16.msra.mxu3 %v372_v2 }
   0xe   :  { %178 = vmatpush.bf16.msra.mxu0 %v371_v3  ;;  %384 = vmatpush.bf16.msra.mxu1 %v371_v3 }
   0xf   :  { %385 = vmatpush.bf16.msra.mxu2 %v371_v3  ;;  %386 = vmatpush.bf16.msra.mxu3 %v371_v3 }
  0x12   :  { %179 = vmatpush.bf16.msra.mxu0 %v370_v4  ;;  %387 = vmatpush.bf16.msra.mxu1 %v370_v4 }
  0x13   :  { %388 = vmatpush.bf16.msra.mxu2 %v370_v4  ;;  %389 = vmatpush.bf16.msra.mxu3 %v370_v4 }
  0x16   :  { %180 = vmatpush.bf16.msra.mxu0 %v369_v5  ;;  %390 = vmatpush.bf16.msra.mxu1 %v369_v5 }
  0x17   :  { %391 = vmatpush.bf16.msra.mxu2 %v369_v5  ;;  %392 = vmatpush.bf16.msra.mxu3 %v369_v5 }
  0x1a   :  { %181 = vmatpush.bf16.msra.mxu0 %v368_v6  ;;  %393 = vmatpush.bf16.msra.mxu1 %v368_v6 }
  0x1b   :  { %394 = vmatpush.bf16.msra.mxu2 %v368_v6  ;;  %395 = vmatpush.bf16.msra.mxu3 %v368_v6 }
  0x1e   :  { %182 = vmatpush.bf16.msra.mxu0 %v367_v7  ;;  %396 = vmatpush.bf16.msra.mxu1 %v367_v7 }
  0x1f   :  { %397 = vmatpush.bf16.msra.mxu2 %v367_v7  ;;  %398 = vmatpush.bf16.msra.mxu3 %v367_v7 }
  0x21   :  { %183 = vmatmul.bf16.vlgmr.msra.gmra.mxu0 %v359_v8  ;;  %193 = vmatmul.bf16.vlgmr.msra.gmra.mxu1 %v361_v9 }
  0x22   :  { %203 = vmatmul.bf16.vlgmr.msra.gmra.mxu2 %v363_v10  ;;  %213 = vmatmul.bf16.vlgmr.msra.gmra.mxu3 %v365_v11 }
  0x31   :  { %188 = vmatmul.bf16.gmra.mxu0 %v360_v12  ;;  %198 = vmatmul.bf16.gmra.mxu1 %v362_v13 }
  0x32   :  { %208 = vmatmul.bf16.gmra.mxu2 %v364_v14  ;;  %218 = vmatmul.bf16.gmra.mxu3 %v366_v15 }
  0x9e   :  { %v184_v16 = vpop.f32.mrf.mxu0  ;;  %v194_v17 = vpop.f32.mrf.mxu1 }
  0x9f   :  { %275 = vst [vmem:[%s512_s2] sm:$0xff] %v184_v16 }
  0xa0   :  { %279 = vst [vmem:[%s512_s2 + $0x20] sm:$0xff] %v194_v17 }
  0xa5   :  { %v204_v18 = vpop.f32.mrf.mxu2  ;;  %v214_v19 = vpop.f32.mrf.mxu3 }
  0xa6   :  { %283 = vst [vmem:[%s512_s2 + $0x40] sm:$0xff] %v204_v18  ;;  %v186_v20 = vpop.f32.mrf.mxu0  ;;  %v196_v21 = vpop.f32.mrf.mxu1 }
  0xa7   :  { %287 = vst [vmem:[%s512_s2 + $0x60] sm:$0xff] %v214_v19 }
  0xa8   :  { %276 = vst [vmem:[%s512_s2 + $0x8] sm:$0xff] %v186_v20 }
  0xa9   :  { %280 = vst [vmem:[%s512_s2 + $0x28] sm:$0xff] %v196_v21 }
  0xad   :  { %v206_v22 = vpop.f32.mrf.mxu2  ;;  %v216_v23 = vpop.f32.mrf.mxu3 }
  0xae   :  { %284 = vst [vmem:[%s512_s2 + $0x48] sm:$0xff] %v206_v22  ;;  %v189_v24 = vpop.f32.mrf.mxu0  ;;  %v199_v25 = vpop.f32.mrf.mxu1 }
  0xaf   :  { %288 = vst [vmem:[%s512_s2 + $0x68] sm:$0xff] %v216_v23 }
  0xb0   :  { %277 = vst [vmem:[%s512_s2 + $0x10] sm:$0xff] %v189_v24 }
  0xb1   :  { %281 = vst [vmem:[%s512_s2 + $0x30] sm:$0xff] %v199_v25 }
  0xb5   :  { %v209_v26 = vpop.f32.mrf.mxu2  ;;  %v219_v27 = vpop.f32.mrf.mxu3 }
  0xb6   :  { %285 = vst [vmem:[%s512_s2 + $0x50] sm:$0xff] %v209_v26  ;;  %v191_v28 = vpop.f32.mrf.mxu0  ;;  %v201_v29 = vpop.f32.mrf.mxu1 }
  0xb7   :  { %289 = vst [vmem:[%s512_s2 + $0x70] sm:$0xff] %v219_v27 }
  0xb8   :  { %278 = vst [vmem:[%s512_s2 + $0x18] sm:$0xff] %v191_v28 }
  0xb9   :  { %282 = vst [vmem:[%s512_s2 + $0x38] sm:$0xff] %v201_v29 }
  0xbd   :  { %v211_v30 = vpop.f32.mrf.mxu2  ;;  %v221_v31 = vpop.f32.mrf.mxu3 }
  0xbe   :  { %286 = vst [vmem:[%s512_s2 + $0x58] sm:$0xff] %v211_v30 }
  0xbf   :  { %290 = vst [vmem:[%s512_s2 + $0x78] sm:$0xff] %v221_v31 }

// kernel: gcn_forward.2
= control target key start
LH: loop header
LB: loop body
LE: loop exit
PB: predicated region body
PF: predicated region fallthrough
CT: control target
= control target key end

     0   :  { %s750_s1 = inlined_call_operand.vmem [shape: bf16[128,128], index: 1, kind: input, shape index: {}]   ;;  %s751_s0 = inlined_call_operand.vmem [shape: bf16[128,128], index: 0, kind: input, shape index: {}]   ;;  %s752_s2 = inlined_call_operand.vmem [shape: bf16[128,128], index: 2, kind: input, shape index: {}]   ;;  %s753_s3 = inlined_call_operand.vmem [shape: bf16[128,128], index: 3, kind: output, shape index: {}]  }
   0x1   :  { %v562_v0 = vld [vmem:[%s750_s1 + $0x38] sm:$0xff]  ;;  %v561_v1 = vld [vmem:[%s750_s1 + $0x30] sm:$0xff]  ;;  %v560_v2 = vld [vmem:[%s750_s1 + $0x28] sm:$0xff] }
   0x2   :  { %178 = vmatpush.bf16.msra.mxu0 %v562_v0  ;;  %618 = vmatpush.bf16.msra.mxu2 %v562_v0  ;;  %v559_v3 = vld [vmem:[%s750_s1 + $0x20] sm:$0xff]  ;;  %v558_v4 = vld [vmem:[%s750_s1 + $0x18] sm:$0xff]  ;;  %v557_v5 = vld [vmem:[%s750_s1 + $0x10] sm:$0xff] }
   0x3   :  { %v556_v6 = vld [vmem:[%s750_s1 + $0x8] sm:$0xff]  ;;  %v555_v7 = vld [vmem:[%s750_s1] sm:$0xff]  ;;  %v570_v12 = vld [vmem:[%s752_s2 + $0x38] sm:$0xff] }
   0x4   :  { %v547_v8 = vld [vmem:[%s751_s0] sm:$0xff]  ;;  %v548_v10 = vld [vmem:[%s751_s0 + $0x8] sm:$0xff]  ;;  %366 = vmatpush.bf16.msra.mxu1 %v570_v12  ;;  %v569_v13 = vld [vmem:[%s752_s2 + $0x30] sm:$0xff]  ;;  %626 = vmatpush.bf16.msra.mxu3 %v570_v12 }
   0x5   :  { %v551_v9 = vld [vmem:[%s751_s0 + $0x20] sm:$0xff]  ;;  %v552_v11 = vld [vmem:[%s751_s0 + $0x28] sm:$0xff]  ;;  %v549_v16 = vld [vmem:[%s751_s0 + $0x10] sm:$0xff] }
   0x6   :  { %179 = vmatpush.bf16.msra.mxu0 %v561_v1  ;;  %619 = vmatpush.bf16.msra.mxu2 %v561_v1  ;;  %v568_v14 = vld [vmem:[%s752_s2 + $0x28] sm:$0xff]  ;;  %v567_v15 = vld [vmem:[%s752_s2 + $0x20] sm:$0xff]  ;;  %v553_v17 = vld [vmem:[%s751_s0 + $0x30] sm:$0xff] }
   0x7   :  { %v566_v18 = vld [vmem:[%s752_s2 + $0x18] sm:$0xff]  ;;  %v565_v21 = vld [vmem:[%s752_s2 + $0x10] sm:$0xff]  ;;  %v564_v22 = vld [vmem:[%s752_s2 + $0x8] sm:$0xff] }
   0x8   :  { %367 = vmatpush.bf16.msra.mxu1 %v569_v13  ;;  %627 = vmatpush.bf16.msra.mxu3 %v569_v13  ;;  %v550_v19 = vld [vmem:[%s751_s0 + $0x18] sm:$0xff]  ;;  %v563_v23 = vld [vmem:[%s752_s2] sm:$0xff] }
   0x9   :  { %v554_v20 = vld [vmem:[%s751_s0 + $0x38] sm:$0xff] }
   0xa   :  { %180 = vmatpush.bf16.msra.mxu0 %v560_v2  ;;  %620 = vmatpush.bf16.msra.mxu2 %v560_v2 }
   0xc   :  { %368 = vmatpush.bf16.msra.mxu1 %v568_v14  ;;  %628 = vmatpush.bf16.msra.mxu3 %v568_v14 }
   0xe   :  { %181 = vmatpush.bf16.msra.mxu0 %v559_v3  ;;  %621 = vmatpush.bf16.msra.mxu2 %v559_v3 }
  0x10   :  { %369 = vmatpush.bf16.msra.mxu1 %v567_v15  ;;  %629 = vmatpush.bf16.msra.mxu3 %v567_v15 }
  0x12   :  { %182 = vmatpush.bf16.msra.mxu0 %v558_v4  ;;  %622 = vmatpush.bf16.msra.mxu2 %v558_v4 }
  0x14   :  { %370 = vmatpush.bf16.msra.mxu1 %v566_v18  ;;  %630 = vmatpush.bf16.msra.mxu3 %v566_v18 }
  0x16   :  { %183 = vmatpush.bf16.msra.mxu0 %v557_v5  ;;  %623 = vmatpush.bf16.msra.mxu2 %v557_v5 }
  0x18   :  { %371 = vmatpush.bf16.msra.mxu1 %v565_v21  ;;  %631 = vmatpush.bf16.msra.mxu3 %v565_v21 }
  0x1a   :  { %184 = vmatpush.bf16.msra.mxu0 %v556_v6  ;;  %624 = vmatpush.bf16.msra.mxu2 %v556_v6 }
  0x1c   :  { %372 = vmatpush.bf16.msra.mxu1 %v564_v22  ;;  %632 = vmatpush.bf16.msra.mxu3 %v564_v22 }
  0x1e   :  { %185 = vmatpush.bf16.msra.mxu0 %v555_v7  ;;  %625 = vmatpush.bf16.msra.mxu2 %v555_v7 }
  0x20   :  { %373 = vmatpush.bf16.msra.mxu1 %v563_v23  ;;  %633 = vmatpush.bf16.msra.mxu3 %v563_v23 }
  0x21   :  { %186 = vmatmul.bf16.vlgmr.msra.gmra.mxu0 %v547_v8  ;;  %206 = vmatmul.bf16.vlgmr.msra.gmra.mxu2 %v551_v9 }
  0x31   :  { %191 = vmatmul.bf16.gmra.mxu0 %v548_v10  ;;  %211 = vmatmul.bf16.gmra.mxu2 %v552_v11 }
  0x41   :  { %196 = vmatmul.bf16.gmra.mxu0 %v549_v16  ;;  %216 = vmatmul.bf16.gmra.mxu2 %v553_v17 }
  0x51   :  { %201 = vmatmul.bf16.gmra.mxu0 %v550_v19  ;;  %221 = vmatmul.bf16.gmra.mxu2 %v554_v20 }
  0x9e   :  { %v187_v24 = vpop.f32.mrf.mxu0 }
  0x9f   :  { %v278_v26 = vmax.f32 %v187_v24, 0.0 }
  0xa4   :  { %v207_v25 = vpop.f32.mrf.mxu2 }
  0xa5   :  { %v286_v31 = vmax.f32 %v207_v25, 0.0 }
  0xa6   :  { %v189_v27 = vpop.f32.mrf.mxu0 }
  0xa7   :  { %v279_v28 = vmax.f32 %v189_v27, 0.0 }
  0xa9   :  { %v294_v29 = vpack.c.bf16 %v279_v28, %v278_v26 }
  0xab   :  { %374 = vmatmul.bf16.vlgmr.msra.gmra.mxu1 %v294_v29 }
  0xac   :  { %v209_v30 = vpop.f32.mrf.mxu2 }
  0xad   :  { %v287_v32 = vmax.f32 %v209_v30, 0.0 }
  0xae   :  { %v192_v33 = vpop.f32.mrf.mxu0 }
  0xaf   :  { %v298_v34 = vpack.c.bf16 %v287_v32, %v286_v31  ;;  %v280_v36 = vmax.f32 %v192_v33, 0.0 }
  0xb1   :  { %394 = vmatmul.bf16.vlgmr.msra.gmra.mxu3 %v298_v34 }
  0xb4   :  { %v212_v35 = vpop.f32.mrf.mxu2 }
  0xb5   :  { %v288_v41 = vmax.f32 %v212_v35, 0.0 }
  0xb6   :  { %v194_v37 = vpop.f32.mrf.mxu0 }
  0xb7   :  { %v281_v38 = vmax.f32 %v194_v37, 0.0 }
  0xb9   :  { %v295_v39 = vpack.c.bf16 %v281_v38, %v280_v36 }
  0xbb   :  { %379 = vmatmul.bf16.gmra.mxu1 %v295_v39 }
  0xbc   :  { %v214_v40 = vpop.f32.mrf.mxu2 }
  0xbd   :  { %v289_v42 = vmax.f32 %v214_v40, 0.0 }
  0xbe   :  { %v197_v43 = vpop.f32.mrf.mxu0 }
  0xbf   :  { %v299_v44 = vpack.c.bf16 %v289_v42, %v288_v41  ;;  %v282_v46 = vmax.f32 %v197_v43, 0.0 }
  0xc1   :  { %399 = vmatmul.bf16.gmra.mxu3 %v299_v44 }
  0xc4   :  { %v217_v45 = vpop.f32.mrf.mxu2 }
  0xc5   :  { %v290_v51 = vmax.f32 %v217_v45, 0.0 }
  0xc6   :  { %v199_v47 = vpop.f32.mrf.mxu0 }
  0xc7   :  { %v283_v48 = vmax.f32 %v199_v47, 0.0 }
  0xc9   :  { %v296_v49 = vpack.c.bf16 %v283_v48, %v282_v46 }
  0xcb   :  { %384 = vmatmul.bf16.gmra.mxu1 %v296_v49 }
  0xcc   :  { %v219_v50 = vpop.f32.mrf.mxu2 }
  0xcd   :  { %v291_v52 = vmax.f32 %v219_v50, 0.0 }
  0xce   :  { %v202_v53 = vpop.f32.mrf.mxu0 }
  0xcf   :  { %v300_v54 = vpack.c.bf16 %v291_v52, %v290_v51  ;;  %v284_v56 = vmax.f32 %v202_v53, 0.0 }
  0xd1   :  { %404 = vmatmul.bf16.gmra.mxu3 %v300_v54 }
  0xd4   :  { %v222_v55 = vpop.f32.mrf.mxu2 }
  0xd5   :  { %v292_v61 = vmax.f32 %v222_v55, 0.0 }
  0xd6   :  { %v204_v57 = vpop.f32.mrf.mxu0 }
  0xd7   :  { %v285_v58 = vmax.f32 %v204_v57, 0.0 }
  0xd9   :  { %v297_v59 = vpack.c.bf16 %v285_v58, %v284_v56 }
  0xdb   :  { %389 = vmatmul.bf16.gmra.mxu1 %v297_v59 }
  0xdc   :  { %v224_v60 = vpop.f32.mrf.mxu2 }
  0xdd   :  { %v293_v62 = vmax.f32 %v224_v60, 0.0 }
  0xdf   :  { %v301_v63 = vpack.c.bf16 %v293_v62, %v292_v61 }
  0xe1   :  { %409 = vmatmul.bf16.gmra.mxu3 %v301_v63 }
 0x128   :  { %v375_v0 = vpop.f32.mrf.mxu1 }
 0x130   :  { %v377_v1 = vpop.f32.mrf.mxu1 }
 0x131   :  { %v574_v2 = vpack.c.bf16 %v377_v1, %v375_v0 }
 0x133   :  { %575 = vst [vmem:[%s753_s3] sm:$0xff] %v574_v2  }
 0x134   :  { %v395_v3 = vpop.f32.mrf.mxu3 }
 0x138   :  { %v380_v4 = vpop.f32.mrf.mxu1 }
 0x13c   :  { %v397_v5 = vpop.f32.mrf.mxu3 }
 0x13d   :  { %v594_v6 = vpack.c.bf16 %v397_v5, %v395_v3 }
 0x13f   :  { %614 = vst [vmem:[%s753_s3 + $0x20] sm:$0xff] %v594_v6  }
 0x140   :  { %v382_v7 = vpop.f32.mrf.mxu1 }
 0x141   :  { %v579_v8 = vpack.c.bf16 %v382_v7, %v380_v4 }
 0x143   :  { %611 = vst [vmem:[%s753_s3 + $0x8] sm:$0xff] %v579_v8  }
 0x144   :  { %v400_v9 = vpop.f32.mrf.mxu3 }
 0x148   :  { %v385_v10 = vpop.f32.mrf.mxu1 }
 0x14c   :  { %v402_v11 = vpop.f32.mrf.mxu3 }
 0x14d   :  { %v599_v12 = vpack.c.bf16 %v402_v11, %v400_v9 }
 0x14f   :  { %615 = vst [vmem:[%s753_s3 + $0x28] sm:$0xff] %v599_v12  }
 0x150   :  { %v387_v13 = vpop.f32.mrf.mxu1 }
 0x151   :  { %v584_v14 = vpack.c.bf16 %v387_v13, %v385_v10 }
 0x153   :  { %612 = vst [vmem:[%s753_s3 + $0x10] sm:$0xff] %v584_v14  }
 0x154   :  { %v405_v15 = vpop.f32.mrf.mxu3 }
 0x158   :  { %v390_v16 = vpop.f32.mrf.mxu1 }
 0x15c   :  { %v407_v17 = vpop.f32.mrf.mxu3 }
 0x15d   :  { %v604_v18 = vpack.c.bf16 %v407_v17, %v405_v15 }
 0x15f   :  { %616 = vst [vmem:[%s753_s3 + $0x30] sm:$0xff] %v604_v18  }
 0x160   :  { %v392_v19 = vpop.f32.mrf.mxu1 }
 0x161   :  { %v589_v20 = vpack.c.bf16 %v392_v19, %v390_v16 }
 0x163   :  { %613 = vst [vmem:[%s753_s3 + $0x18] sm:$0xff] %v589_v20  }
 0x164   :  { %v410_v21 = vpop.f32.mrf.mxu3 }
 0x16c   :  { %v412_v22 = vpop.f32.mrf.mxu3 }
 0x16d   :  { %v609_v23 = vpack.c.bf16 %v412_v22, %v410_v21 }
 0x16f   :  { %617 = vst [vmem:[%s753_s3 + $0x38] sm:$0xff] %v609_v23  }

</bundles_post_ra>
